<compile_context>
chip_gen: v5e
topology: v5e:2x2
jax: 0.10.0
libtpu: 0.0.40
codegen_flags: <defaults>
</compile_context>

<pallas_src>
import functools

import jax
import jax.numpy as jnp
from jax.experimental import pallas as pl
from jax.experimental.pallas import tpu as pltpu


def mlp_kernel(x_ref, w1_ref, b1_ref, w2_ref, b2_ref, o_ref):
    # Fused Linear -> ReLU -> Linear, fully in VMEM. Matmuls run on the MXU in
    # the compute dtype (bf16 by default) with f32 accumulation; bias add and
    # ReLU stay f32 on the VPU (v5e has no bf16 VPU path).
    x = x_ref[...]                                            # (tm, n_feature)
    h = jnp.dot(x, w1_ref[...], preferred_element_type=jnp.float32)
    h = jnp.maximum(h + b1_ref[...], 0.0)                     # f32 bias + ReLU
    y = jnp.dot(h.astype(w2_ref.dtype), w2_ref[...],
                preferred_element_type=jnp.float32)
    o_ref[...] = (y + b2_ref[...]).astype(o_ref.dtype)


def _round_up(v, m):
    return ((v + m - 1) // m) * m


@functools.partial(jax.jit, static_argnames=("compute_dtype",))
def net_forward(x, w1, b1, w2, b2, *, compute_dtype=jnp.bfloat16):
    m, n_feature = x.shape
    n_hidden = w1.shape[1]
    n_output = w2.shape[1]
    out_dtype = x.dtype

    # Lane-dense output: pad n_output up to a multiple of 128 so output stores
    # are unmasked full-vreg vst's and the 2nd matmul uses a full MXU N dim.
    n_out_pad = _round_up(n_output, 128)

    # Batch tiling: a single grid step for small batches (no per-step pipeline
    # overhead), otherwise 128-row tiles (full MXU M dim; "parallel" batch axis
    # shards the grid across v7x's two TensorCores).
    sublane = 16 if jnp.dtype(compute_dtype) == jnp.dtype(jnp.bfloat16) else 8
    if m <= 256:
        tm = _round_up(m, sublane)
        grid_m = 1
    else:
        tm = 128
        grid_m = pl.cdiv(m, tm)
    m_pad = tm * grid_m

    # Resident-weight layout only works while W1/W2 fit comfortably in VMEM
    # (v7x: 64 MiB physical, 32 MiB scoped default).
    # TODO(synk): add K-tiling over n_feature (accumulator + "arbitrary" grid
    # axis) when the resident W1 block no longer fits VMEM.
    itemsize = jnp.dtype(compute_dtype).itemsize
    resident_bytes = (n_feature * n_hidden + n_hidden * n_out_pad) * itemsize
    assert resident_bytes < (24 << 20), (
        "weights too large for resident-weight layout; needs K-tiling")

    # Pad ragged batch and lane-sparse output dims with zeros.
    if m_pad != m:
        x = jnp.pad(x, ((0, m_pad - m), (0, 0)))
    if n_out_pad != n_output:
        w2 = jnp.pad(w2, ((0, 0), (0, n_out_pad - n_output)))
        b2 = jnp.pad(b2, (0, n_out_pad - n_output))

    xc = x.astype(compute_dtype)
    w1c = w1.astype(compute_dtype)
    w2c = w2.astype(compute_dtype)
    b1_2d = b1.reshape(1, n_hidden).astype(jnp.float32)
    b2_2d = b2.reshape(1, n_out_pad).astype(jnp.float32)

    cost = pl.CostEstimate(
        flops=2 * m_pad * (n_feature * n_hidden + n_hidden * n_out_pad),
        transcendentals=0,
        bytes_accessed=(m_pad * n_feature * itemsize
                        + n_feature * n_hidden * itemsize
                        + n_hidden * n_out_pad * itemsize
                        + (n_hidden + n_out_pad) * 4
                        + m_pad * n_out_pad * 4),
    )

    out = pl.pallas_call(
        mlp_kernel,
        out_shape=jax.ShapeDtypeStruct((m_pad, n_out_pad), jnp.float32),
        grid_spec=pltpu.PrefetchScalarGridSpec(
            num_scalar_prefetch=0,
            grid=(grid_m,),
            in_specs=[
                pl.BlockSpec((tm, n_feature), lambda i: (i, 0)),        # x tile
                # Weight/bias index_maps are grid-invariant, so Pallas keeps the
                # blocks VMEM-resident instead of re-DMAing them every step.
                pl.BlockSpec((n_feature, n_hidden), lambda i: (0, 0)),  # W1
                pl.BlockSpec((1, n_hidden), lambda i: (0, 0)),          # b1
                pl.BlockSpec((n_hidden, n_out_pad), lambda i: (0, 0)),  # W2 (padded)
                pl.BlockSpec((1, n_out_pad), lambda i: (0, 0)),         # b2 (padded)
            ],
            out_specs=pl.BlockSpec((tm, n_out_pad), lambda i: (i, 0)),
        ),
        compiler_params=pltpu.CompilerParams(
            dimension_semantics=("parallel",)),
        cost_estimate=cost,
    )(xc, w1c, b1_2d, w2c, b2_2d)

    # Slice away batch padding and output lane padding.
    return out[:m, :n_output].astype(out_dtype)


def init_linear_params(key, in_features, out_features, dtype=jnp.float32):
    # Deterministic init mimicking PyTorch Linear default: U(-1/sqrt(in), 1/sqrt(in)).
    kw, kb = jax.random.split(key)
    bound = 1.0 / jnp.sqrt(jnp.asarray(in_features, dtype))
    # Stored as (in, out) == PyTorch weight.T
    w = jax.random.uniform(kw, (in_features, out_features), dtype,
                           minval=-bound, maxval=bound)
    b = jax.random.uniform(kb, (out_features,), dtype,
                           minval=-bound, maxval=bound)
    return w, b


if __name__ == "__main__":
    # Small shapes consistent with Net(n_feature, n_hidden, n_output).
    # batch=209 matches the ragged batch of the original script (exercises padding).
    batch, n_feature, n_hidden, n_output = 209, 256, 128, 16

    key = jax.random.PRNGKey(0)
    kx, k1, k2 = jax.random.split(key, 3)

    x = jax.random.normal(kx, (batch, n_feature), jnp.float32)
    w1, b1 = init_linear_params(k1, n_feature, n_hidden)
    w2, b2 = init_linear_params(k2, n_hidden, n_output)

    out = net_forward(x, w1, b1, w2, b2)
    jax.block_until_ready(out)

    # Pure-JAX f32 reference of the forward semantics (kernel runs in bf16 with
    # f32 accumulation, so the tolerance is loosened accordingly).
    ref = jnp.maximum(x @ w1 + b1, 0.0) @ w2 + b2
    assert out.shape == (batch, n_output)
    assert jnp.allclose(out, ref, atol=5e-2, rtol=5e-2), "mismatch vs reference"

    print("KERNEL_OK")
</pallas_src>

<mosaic_0001>
module attributes {stable_mosaic.version = 11 : i64} {
  func.func @mlp_kernel(%arg0: i32, %arg1: memref<224x256xbf16, #tpu.memory_space<vmem>>, %arg2: memref<256x128xbf16, #tpu.memory_space<vmem>>, %arg3: memref<1x128xf32, #tpu.memory_space<vmem>>, %arg4: memref<128x128xbf16, #tpu.memory_space<vmem>>, %arg5: memref<1x128xf32, #tpu.memory_space<vmem>>, %arg6: memref<224x128xf32, #tpu.memory_space<vmem>>) attributes {dimension_semantics = [#tpu.dimension_semantics<parallel>], iteration_bounds = array<i64: 1>, scalar_prefetch = 0 : i64, scratch_operands = 0 : i64, tpu.core_type = #tpu.core_type<tc>, window_params = [{transform_indices = @transform_0, window_bounds = array<i64: 224, 256>}, {pipeline_mode = #tpu.pipeline_mode<synchronous>, transform_indices = @transform_1, window_bounds = array<i64: 256, 128>}, {pipeline_mode = #tpu.pipeline_mode<synchronous>, transform_indices = @transform_2, window_bounds = array<i64: 1, 128>}, {pipeline_mode = #tpu.pipeline_mode<synchronous>, transform_indices = @transform_3, window_bounds = array<i64: 128, 128>}, {pipeline_mode = #tpu.pipeline_mode<synchronous>, transform_indices = @transform_4, window_bounds = array<i64: 1, 128>}, {transform_indices = @transform_5, window_bounds = array<i64: 224, 128>}]} {
    %c0 = arith.constant 0 : index
    %c0_0 = arith.constant 0 : index
    %0 = vector.load %arg1[%c0, %c0_0] : memref<224x256xbf16, #tpu.memory_space<vmem>>, vector<224x256xbf16>
    %c0_1 = arith.constant 0 : index
    %c0_2 = arith.constant 0 : index
    %1 = vector.load %arg2[%c0_1, %c0_2] : memref<256x128xbf16, #tpu.memory_space<vmem>>, vector<256x128xbf16>
    %cst = arith.constant dense<0.000000e+00> : vector<224x128xf32>
    %2 = tpu.matmul %0, %1, %cst {dimension_numbers = #tpu.dot_dimension_numbers<[1], [0], [0], [1], [0, 0, 1, 1], [], []>} : vector<224x256xbf16>, vector<256x128xbf16>, vector<224x128xf32> -> vector<224x128xf32>
    %c0_3 = arith.constant 0 : index
    %c0_4 = arith.constant 0 : index
    %3 = vector.load %arg3[%c0_3, %c0_4] : memref<1x128xf32, #tpu.memory_space<vmem>>, vector<1x128xf32>
    %4 = vector.broadcast %3 : vector<1x128xf32> to vector<224x128xf32>
    %5 = arith.addf %2, %4 : vector<224x128xf32>
    %cst_5 = arith.constant 0.000000e+00 : f32
    %6 = vector.broadcast %cst_5 : f32 to vector<224x128xf32>
    %7 = arith.maximumf %5, %6 : vector<224x128xf32>
    %8 = arith.truncf %7 : vector<224x128xf32> to vector<224x128xbf16>
    %c0_6 = arith.constant 0 : index
    %c0_7 = arith.constant 0 : index
    %9 = vector.load %arg4[%c0_6, %c0_7] : memref<128x128xbf16, #tpu.memory_space<vmem>>, vector<128x128xbf16>
    %cst_8 = arith.constant dense<0.000000e+00> : vector<224x128xf32>
    %10 = tpu.matmul %8, %9, %cst_8 {dimension_numbers = #tpu.dot_dimension_numbers<[1], [0], [0], [1], [0, 0, 1, 1], [], []>} : vector<224x128xbf16>, vector<128x128xbf16>, vector<224x128xf32> -> vector<224x128xf32>
    %c0_9 = arith.constant 0 : index
    %c0_10 = arith.constant 0 : index
    %11 = vector.load %arg5[%c0_9, %c0_10] : memref<1x128xf32, #tpu.memory_space<vmem>>, vector<1x128xf32>
    %12 = vector.broadcast %11 : vector<1x128xf32> to vector<224x128xf32>
    %13 = arith.addf %10, %12 : vector<224x128xf32>
    %c0_11 = arith.constant 0 : index
    %c0_12 = arith.constant 0 : index
    %14 = vector.load %arg6[%c0_11, %c0_12] : memref<224x128xf32, #tpu.memory_space<vmem>>, vector<224x128xf32>
    tpu.vector_store %arg6[%c0_11, %c0_12], %13 {strides = array<i32>} : memref<224x128xf32, #tpu.memory_space<vmem>>, vector<224x128xf32>,
    return
  }
  func.func @transform_0(%arg0: i32) -> (i32, i32) {
    %c0_i32 = arith.constant 0 : i32
    %c0_i32_0 = arith.constant 0 : i32
    return %arg0, %c0_i32 : i32, i32
  }
  func.func @transform_1(%arg0: i32) -> (i32, i32) {
    %c0_i32 = arith.constant 0 : i32
    %c0_i32_0 = arith.constant 0 : i32
    %c0_i32_1 = arith.constant 0 : i32
    return %c0_i32, %c0_i32_0 : i32, i32
  }
  func.func @transform_2(%arg0: i32) -> (i32, i32) {
    %c0_i32 = arith.constant 0 : i32
    %c0_i32_0 = arith.constant 0 : i32
    %c0_i32_1 = arith.constant 0 : i32
    return %c0_i32, %c0_i32_0 : i32, i32
  }
  func.func @transform_3(%arg0: i32) -> (i32, i32) {
    %c0_i32 = arith.constant 0 : i32
    %c0_i32_0 = arith.constant 0 : i32
    %c0_i32_1 = arith.constant 0 : i32
    return %c0_i32, %c0_i32_0 : i32, i32
  }
  func.func @transform_4(%arg0: i32) -> (i32, i32) {
    %c0_i32 = arith.constant 0 : i32
    %c0_i32_0 = arith.constant 0 : i32
    %c0_i32_1 = arith.constant 0 : i32
    return %c0_i32, %c0_i32_0 : i32, i32
  }
  func.func @transform_5(%arg0: i32) -> (i32, i32) {
    %c0_i32 = arith.constant 0 : i32
    %c0_i32_0 = arith.constant 0 : i32
    return %arg0, %c0_i32 : i32, i32
  }
}

</mosaic_0001>

<bundles_post_ra>
// kernel: net_forward.1
= control target key start
LH: loop header
LB: loop body
LE: loop exit
PB: predicated region body
PF: predicated region fallthrough
CT: control target
= control target key end

     0   :  { %s1405_s1 = inlined_call_operand.vmem [shape: bf16[256,128], index: 1, kind: input, shape index: {}]   ;;  %s1406_s2 = inlined_call_operand.vmem [shape: f32[1,128], index: 2, kind: input, shape index: {}]   ;;  %s1407_s0 = inlined_call_operand.vmem [shape: bf16[224,256], index: 0, kind: input, shape index: {}]   ;;  %s1408_s3 = inlined_call_operand.vmem [shape: bf16[128,128], index: 3, kind: input, shape index: {}]   ;;  %s1409_s4 = inlined_call_operand.vmem [shape: f32[1,128], index: 4, kind: input, shape index: {}]   ;;  %s1410_s5 = inlined_call_operand.vmem [shape: f32[224,128], index: 5, kind: output, shape index: {}]  }
   0x1   :  { %v942_v0 = vld [vmem:[%s1405_s1 + $0x38] sm:$0xff]  ;;  %v941_v2 = vld [vmem:[%s1405_s1 + $0x30] sm:$0xff]  ;;  %v940_v4 = vld [vmem:[%s1405_s1 + $0x28] sm:$0xff] }
   0x2   :  { %v950_v1 = vld [vmem:[%s1405_s1 + $0x78] sm:$0xff]  ;;  %320 = vmatpush.bf16.msra.mxu0 %v942_v0  ;;  %v949_v3 = vld [vmem:[%s1405_s1 + $0x70] sm:$0xff]  ;;  %959 = vmatpush.bf16.msra.mxu3 %v942_v0  ;;  %v948_v5 = vld [vmem:[%s1405_s1 + $0x68] sm:$0xff] }
   0x3   :  { %399 = vmatpush.bf16.msra.mxu1 %v950_v1  ;;  %v939_v6 = vld [vmem:[%s1405_s1 + $0x20] sm:$0xff]  ;;  %v938_v8 = vld [vmem:[%s1405_s1 + $0x18] sm:$0xff]  ;;  %v937_v10 = vld [vmem:[%s1405_s1 + $0x10] sm:$0xff] }
   0x4   :  { %v947_v7 = vld [vmem:[%s1405_s1 + $0x60] sm:$0xff]  ;;  %v946_v9 = vld [vmem:[%s1405_s1 + $0x58] sm:$0xff]  ;;  %v945_v11 = vld [vmem:[%s1405_s1 + $0x50] sm:$0xff] }
   0x5   :  { %v936_v12 = vld [vmem:[%s1405_s1 + $0x8] sm:$0xff]  ;;  %v935_v14 = vld [vmem:[%s1405_s1] sm:$0xff]  ;;  %v789_v20 = vld [vmem:[%s1407_s0 + $0xb0] sm:$0xf] }
   0x6   :  { %321 = vmatpush.bf16.msra.mxu0 %v941_v2  ;;  %960 = vmatpush.bf16.msra.mxu3 %v941_v2  ;;  %v944_v13 = vld [vmem:[%s1405_s1 + $0x48] sm:$0xff]  ;;  %v943_v15 = vld [vmem:[%s1405_s1 + $0x40] sm:$0xff]  ;;  %v930_v21 = vld [vmem:[%s1407_s0 + $0xb4] sm:$0xf0] }
   0x7   :  { %400 = vmatpush.bf16.msra.mxu1 %v949_v3  ;;  %v701_v16 = vld [vmem:[%s1407_s0] sm:$0xf]  ;;  %v908_v17 = vld [vmem:[%s1407_s0 + $0x4] sm:$0xf0]  ;;  %v907_v18 = vld [vmem:[%s1407_s0 + $0x4] sm:$0xf]  ;;  %v790_v24 = vor.u32 %v930_v21, %v789_v20 }
   0x8   :  { %v703_v19 = vld [vmem:[%s1407_s0 + $0x8] sm:$0xf0]  ;;  %v702_v22 = vor.u32 %v908_v17, %v701_v16  ;;  %v709_v25 = vld [vmem:[%s1407_s0 + $0x10] sm:$0xf]  ;;  %v910_v26 = vld [vmem:[%s1407_s0 + $0x14] sm:$0xf0] }
   0x9   :  { %v706_v23 = vor.u32 %v907_v18, %v703_v19  ;;  %v909_v27 = vld [vmem:[%s1407_s0 + $0x14] sm:$0xf]  ;;  %v711_v28 = vld [vmem:[%s1407_s0 + $0x18] sm:$0xf0]  ;;  %v797_v29 = vld [vmem:[%s1407_s0 + $0xc0] sm:$0xf]  ;;  %v710_v31 = vor.u32 %v910_v26, %v709_v25 }
   0xa   :  { %322 = vmatpush.bf16.msra.mxu0 %v940_v4  ;;  %961 = vmatpush.bf16.msra.mxu3 %v940_v4  ;;  %v932_v30 = vld [vmem:[%s1407_s0 + $0xc4] sm:$0xf0]  ;;  %v714_v32 = vor.u32 %v909_v27, %v711_v28  ;;  %v717_v34 = vld [vmem:[%s1407_s0 + $0x20] sm:$0xf]  ;;  %v911_v36 = vld [vmem:[%s1407_s0 + $0x24] sm:$0xf] }
   0xb   :  { %401 = vmatpush.bf16.msra.mxu1 %v948_v5  ;;  %v798_v33 = vor.u32 %v932_v30, %v797_v29  ;;  %v912_v35 = vld [vmem:[%s1407_s0 + $0x24] sm:$0xf0]  ;;  %v719_v37 = vld [vmem:[%s1407_s0 + $0x28] sm:$0xf0]  ;;  %v805_v38 = vld [vmem:[%s1407_s0 + $0xd0] sm:$0xf] }
   0xc   :  { %v934_v39 = vld [vmem:[%s1407_s0 + $0xd4] sm:$0xf0]  ;;  %v718_v40 = vor.u32 %v912_v35, %v717_v34  ;;  %v722_v41 = vor.u32 %v911_v36, %v719_v37  ;;  %v725_v43 = vld [vmem:[%s1407_s0 + $0x30] sm:$0xf]  ;;  %v913_v45 = vld [vmem:[%s1407_s0 + $0x34] sm:$0xf] }
   0xd   :  { %v806_v42 = vor.u32 %v934_v39, %v805_v38  ;;  %v914_v44 = vld [vmem:[%s1407_s0 + $0x34] sm:$0xf0]  ;;  %v727_v46 = vld [vmem:[%s1407_s0 + $0x38] sm:$0xf0]  ;;  %v929_v47 = vld [vmem:[%s1407_s0 + $0xb4] sm:$0xf] }
   0xe   :  { %323 = vmatpush.bf16.msra.mxu0 %v939_v6  ;;  %962 = vmatpush.bf16.msra.mxu3 %v939_v6  ;;  %v791_v48 = vld [vmem:[%s1407_s0 + $0xb8] sm:$0xf0]  ;;  %v726_v49 = vor.u32 %v914_v44, %v725_v43  ;;  %v730_v50 = vor.u32 %v913_v45, %v727_v46  ;;  %v733_v52 = vld [vmem:[%s1407_s0 + $0x40] sm:$0xf]  ;;  %v916_v53 = vld [vmem:[%s1407_s0 + $0x44] sm:$0xf0] }
   0xf   :  { %402 = vmatpush.bf16.msra.mxu1 %v947_v7  ;;  %v794_v51 = vor.u32 %v929_v47, %v791_v48  ;;  %v915_v54 = vld [vmem:[%s1407_s0 + $0x44] sm:$0xf]  ;;  %v735_v55 = vld [vmem:[%s1407_s0 + $0x48] sm:$0xf0]  ;;  %v734_v58 = vor.u32 %v916_v53, %v733_v52  ;;  %v958_v61 = vld [vmem:[%s1408_s3 + $0x38] sm:$0xff] }
  0x10   :  { %v931_v56 = vld [vmem:[%s1407_s0 + $0xc4] sm:$0xf]  ;;  %v799_v57 = vld [vmem:[%s1407_s0 + $0xc8] sm:$0xf0]  ;;  %v738_v59 = vor.u32 %v915_v54, %v735_v55  ;;  %588 = vmatpush.bf16.msra.mxu2 %v958_v61  ;;  %v741_v62 = vld [vmem:[%s1407_s0 + $0x50] sm:$0xf] }
  0x11   :  { %v802_v60 = vor.u32 %v931_v56, %v799_v57  ;;  %v918_v63 = vld [vmem:[%s1407_s0 + $0x54] sm:$0xf0]  ;;  %v917_v0 = vld [vmem:[%s1407_s0 + $0x54] sm:$0xf]  ;;  %v952_v18 = vld [vmem:[%s1408_s3 + $0x8] sm:$0xff] }
  0x12   :  { %324 = vmatpush.bf16.msra.mxu0 %v938_v8  ;;  %963 = vmatpush.bf16.msra.mxu3 %v938_v8  ;;  %v933_v2 = vld [vmem:[%s1407_s0 + $0xd4] sm:$0xf]  ;;  %v742_v4 = vor.u32 %v918_v63, %v741_v62  ;;  %v956_v8 = vld [vmem:[%s1408_s3 + $0x28] sm:$0xff]  ;;  %v954_v16 = vld [vmem:[%s1408_s3 + $0x18] sm:$0xff] }
  0x13   :  { %403 = vmatpush.bf16.msra.mxu1 %v946_v9  ;;  %v953_v17 = vld [vmem:[%s1408_s3 + $0x10] sm:$0xff]  ;;  %v922_v20 = vld [vmem:[%s1407_s0 + $0x74] sm:$0xf0]  ;;  %v765_v26 = vld [vmem:[%s1407_s0 + $0x80] sm:$0xf] }
  0x14   :  { %v757_v19 = vld [vmem:[%s1407_s0 + $0x70] sm:$0xf]  ;;  %v921_v21 = vld [vmem:[%s1407_s0 + $0x74] sm:$0xf]  ;;  %v924_v27 = vld [vmem:[%s1407_s0 + $0x84] sm:$0xf0] }
  0x15   :  { %v923_v28 = vld [vmem:[%s1407_s0 + $0x84] sm:$0xf]  ;;  %v767_v29 = vld [vmem:[%s1407_s0 + $0x88] sm:$0xf0]  ;;  %v766_v30 = vor.u32 %v924_v27, %v765_v26  ;;  %v1234_v34 = vld [vmem:[%s1406_s2] ss:$0 sm:$0xff] }
  0x16   :  { %325 = vmatpush.bf16.msra.mxu0 %v937_v10  ;;  %964 = vmatpush.bf16.msra.mxu3 %v937_v10  ;;  %v749_v10 = vld [vmem:[%s1407_s0 + $0x60] sm:$0xf]  ;;  %v926_v43 = vld [vmem:[%s1407_s0 + $0x94] sm:$0xf0]  ;;  %v925_v44 = vld [vmem:[%s1407_s0 + $0x94] sm:$0xf] }
  0x17   :  { %404 = vmatpush.bf16.msra.mxu1 %v945_v11  ;;  %v775_v45 = vld [vmem:[%s1407_s0 + $0x98] sm:$0xf0]  ;;  %v928_v62 = vld [vmem:[%s1407_s0 + $0xa4] sm:$0xf0]  ;;  %v927_v63 = vld [vmem:[%s1407_s0 + $0xa4] sm:$0xf] }
  0x1a   :  { %326 = vmatpush.bf16.msra.mxu0 %v936_v12  ;;  %965 = vmatpush.bf16.msra.mxu3 %v936_v12  ;;  %v919_v12 = vld [vmem:[%s1407_s0 + $0x64] sm:$0xf] }
  0x1b   :  { %405 = vmatpush.bf16.msra.mxu1 %v944_v13 }
  0x1e   :  { %327 = vmatpush.bf16.msra.mxu0 %v935_v14  ;;  %966 = vmatpush.bf16.msra.mxu3 %v935_v14 }
  0x1f   :  { %406 = vmatpush.bf16.msra.mxu1 %v943_v15 }
  0x21   :  { %328 = vmatmul.bf16.vlgmr.msra.gmra.mxu0 %v702_v22  ;;  %383 = vmatmul.bf16.vlgmr.msra.gmra.mxu3 %v790_v24  ;;  %v759_v22 = vld [vmem:[%s1407_s0 + $0x78] sm:$0xf0]  ;;  %v758_v24 = vor.u32 %v922_v20, %v757_v19 }
  0x22   :  { %967 = vmatpush.bf16.msrb.mxu3 %v950_v1  ;;  %407 = vmatmul.bf16.vlgmr.msra.gmra.mxu1 %v706_v23  ;;  %v743_v1 = vld [vmem:[%s1407_s0 + $0x58] sm:$0xf0]  ;;  %v951_v23 = vld [vmem:[%s1408_s3] sm:$0xff]  ;;  %v762_v25 = vor.u32 %v921_v21, %v759_v22 }
  0x26   :  { %968 = vmatpush.bf16.msrb.mxu3 %v949_v3  ;;  %v807_v3 = vld [vmem:[%s1407_s0 + $0xd8] sm:$0xf0] }
  0x27   :  { %v810_v6 = vor.u32 %v933_v2, %v807_v3 }
  0x2a   :  { %969 = vmatpush.bf16.msrb.mxu3 %v948_v5  ;;  %v746_v5 = vor.u32 %v917_v0, %v743_v1  ;;  %v783_v0 = vld [vmem:[%s1407_s0 + $0xa8] sm:$0xf0] }
  0x2e   :  { %970 = vmatpush.bf16.msrb.mxu3 %v947_v7  ;;  %v957_v7 = vld [vmem:[%s1408_s3 + $0x30] sm:$0xff] }
  0x2f   :  { %589 = vmatpush.bf16.msra.mxu2 %v957_v7 }
  0x31   :  { %333 = vmatmul.bf16.gmra.mxu0 %v710_v31  ;;  %388 = vmatmul.bf16.gmra.mxu3 %v798_v33  ;;  %v770_v31 = vor.u32 %v923_v28, %v767_v29 }
  0x32   :  { %971 = vmatpush.bf16.msrb.mxu3 %v946_v9  ;;  %412 = vmatmul.bf16.gmra.mxu1 %v714_v32  ;;  %v955_v9 = vld [vmem:[%s1408_s3 + $0x20] sm:$0xff] }
  0x33   :  { %590 = vmatpush.bf16.msra.mxu2 %v956_v8 }
  0x36   :  { %972 = vmatpush.bf16.msrb.mxu3 %v945_v11  ;;  %v920_v11 = vld [vmem:[%s1407_s0 + $0x64] sm:$0xf0] }
  0x37   :  { %591 = vmatpush.bf16.msra.mxu2 %v955_v9  ;;  %v750_v14 = vor.u32 %v920_v11, %v749_v10 }
  0x3a   :  { %973 = vmatpush.bf16.msrb.mxu3 %v944_v13  ;;  %v751_v13 = vld [vmem:[%s1407_s0 + $0x68] sm:$0xf0] }
  0x3b   :  { %592 = vmatpush.bf16.msra.mxu2 %v954_v16 }
  0x3e   :  { %974 = vmatpush.bf16.msrb.mxu3 %v943_v15  ;;  %v754_v15 = vor.u32 %v919_v12, %v751_v13 }
  0x3f   :  { %593 = vmatpush.bf16.msra.mxu2 %v953_v17 }
  0x41   :  { %338 = vmatmul.bf16.gmra.mxu0 %v718_v40  ;;  %393 = vmatmul.bf16.gmra.mxu3 %v806_v42  ;;  %v773_v42 = vld [vmem:[%s1407_s0 + $0x90] sm:$0xf] }
  0x42   :  { %417 = vmatmul.bf16.gmra.mxu1 %v722_v41  ;;  %975 = vmatpush.bf16.msra.mxu3 %v958_v61  ;;  %v781_v61 = vld [vmem:[%s1407_s0 + $0xa0] sm:$0xf] }
  0x43   :  { %594 = vmatpush.bf16.msra.mxu2 %v952_v18 }
  0x46   :  { %976 = vmatpush.bf16.msra.mxu3 %v957_v7 }
  0x47   :  { %595 = vmatpush.bf16.msra.mxu2 %v951_v23 }
  0x4a   :  { %977 = vmatpush.bf16.msra.mxu3 %v956_v8 }
  0x4e   :  { %978 = vmatpush.bf16.msra.mxu3 %v955_v9 }
  0x51   :  { %343 = vmatmul.bf16.gmra.mxu0 %v726_v49  ;;  %462 = vmatmul.bf16.vlgmr.msrb.gmra.mxu3 %v794_v51  ;;  %v774_v49 = vor.u32 %v926_v43, %v773_v42 }
  0x52   :  { %422 = vmatmul.bf16.gmra.mxu1 %v730_v50  ;;  %979 = vmatpush.bf16.msra.mxu3 %v954_v16  ;;  %v778_v50 = vor.u32 %v925_v44, %v775_v45 }
  0x56   :  { %980 = vmatpush.bf16.msra.mxu3 %v953_v17 }
  0x5a   :  { %981 = vmatpush.bf16.msra.mxu3 %v952_v18 }
  0x5e   :  { %982 = vmatpush.bf16.msra.mxu3 %v951_v23 }
  0x61   :  { %348 = vmatmul.bf16.gmra.mxu0 %v734_v58  ;;  %467 = vmatmul.bf16.gmra.mxu3 %v802_v60 }
  0x62   :  { %427 = vmatmul.bf16.gmra.mxu1 %v738_v59 }
  0x71   :  { %353 = vmatmul.bf16.gmra.mxu0 %v742_v4  ;;  %472 = vmatmul.bf16.gmra.mxu3 %v810_v6  ;;  %v782_v4 = vor.u32 %v928_v62, %v781_v61 }
  0x72   :  { %432 = vmatmul.bf16.gmra.mxu1 %v746_v5  ;;  %v786_v5 = vor.u32 %v927_v63, %v783_v0 }
  0x81   :  { %358 = vmatmul.bf16.gmra.mxu0 %v750_v14 }
  0x82   :  { %437 = vmatmul.bf16.gmra.mxu1 %v754_v15 }
  0x91   :  { %363 = vmatmul.bf16.gmra.mxu0 %v758_v24 }
  0x92   :  { %442 = vmatmul.bf16.gmra.mxu1 %v762_v25 }
  0x9e   :  { %v329_v32 = vpop.f32.mrf.mxu0 }
  0x9f   :  { %v408_v33 = vpop.f32.mrf.mxu1  ;;  %v330_v35 = vadd.f32 %v1234_v34, %v329_v32 }
  0xa1   :  { %368 = vmatmul.bf16.gmra.mxu0 %v766_v30  ;;  %v409_v39 = vadd.f32 %v408_v33, %v330_v35 }
  0xa2   :  { %447 = vmatmul.bf16.gmra.mxu1 %v770_v31 }
  0xa3   :  { %v478_v46 = vmax.f32 %v409_v39, 0.0 }
  0xa4   :  { %v384_v36 = vpop.f32.mrf.mxu3 }
  0xa5   :  { %v385_v24 = vadd.f32 %v1234_v34, %v384_v36 }
  0xa6   :  { %v331_v37 = vpop.f32.mrf.mxu0 }
  0xa7   :  { %v410_v38 = vpop.f32.mrf.mxu1  ;;  %v332_v40 = vadd.f32 %v1234_v34, %v331_v37 }
  0xa9   :  { %v411_v41 = vadd.f32 %v410_v38, %v332_v40 }
  0xab   :  { %v479_v47 = vmax.f32 %v411_v41, 0.0 }
  0xac   :  { %v386_v51 = vpop.f32.mrf.mxu3 }
  0xad   :  { %v506_v48 = vpack.c.bf16 %v479_v47, %v478_v46  ;;  %v387_v30 = vadd.f32 %v1234_v34, %v386_v51 }
  0xae   :  { %v334_v52 = vpop.f32.mrf.mxu0 }
  0xaf   :  { %v413_v53 = vpop.f32.mrf.mxu1  ;;  %596 = vmatmul.bf16.vlgmr.msra.gmra.mxu2 %v506_v48  ;;  %v335_v54 = vadd.f32 %v1234_v34, %v334_v52 }
  0xb1   :  { %373 = vmatmul.bf16.gmra.mxu0 %v774_v49  ;;  %v414_v58 = vadd.f32 %v413_v53, %v335_v54 }
  0xb2   :  { %452 = vmatmul.bf16.gmra.mxu1 %v778_v50 }
  0xb3   :  { %v480_v1 = vmax.f32 %v414_v58, 0.0 }
  0xb4   :  { %v389_v55 = vpop.f32.mrf.mxu3 }
  0xb5   :  { %v390_v45 = vadd.f32 %v1234_v34, %v389_v55 }
  0xb6   :  { %v336_v56 = vpop.f32.mrf.mxu0 }
  0xb7   :  { %v415_v57 = vpop.f32.mrf.mxu1  ;;  %v337_v59 = vadd.f32 %v1234_v34, %v336_v56 }
  0xb9   :  { %v416_v60 = vadd.f32 %v415_v57, %v337_v59 }
  0xbb   :  { %v481_v2 = vmax.f32 %v416_v60, 0.0 }
  0xbc   :  { %v391_v6 = vpop.f32.mrf.mxu3 }
  0xbd   :  { %v507_v3 = vpack.c.bf16 %v481_v2, %v480_v1  ;;  %v392_v51 = vadd.f32 %v1234_v34, %v391_v6 }
  0xbe   :  { %v339_v7 = vpop.f32.mrf.mxu0 }
  0xbf   :  { %v418_v8 = vpop.f32.mrf.mxu1  ;;  %601 = vmatmul.bf16.gmra.mxu2 %v507_v3  ;;  %v340_v9 = vadd.f32 %v1234_v34, %v339_v7 }
  0xc1   :  { %378 = vmatmul.bf16.gmra.mxu0 %v782_v4  ;;  %v419_v13 = vadd.f32 %v418_v8, %v340_v9 }
  0xc2   :  { %457 = vmatmul.bf16.gmra.mxu1 %v786_v5 }
  0xc3   :  { %v482_v16 = vmax.f32 %v419_v13, 0.0 }
  0xc4   :  { %v394_v10 = vpop.f32.mrf.mxu3 }
  0xc5   :  { %v395_v1 = vadd.f32 %v1234_v34, %v394_v10 }
  0xc6   :  { %v341_v11 = vpop.f32.mrf.mxu0 }
  0xc7   :  { %v420_v12 = vpop.f32.mrf.mxu1  ;;  %v342_v14 = vadd.f32 %v1234_v34, %v341_v11 }
  0xc9   :  { %v421_v15 = vadd.f32 %v420_v12, %v342_v14 }
  0xcb   :  { %v483_v17 = vmax.f32 %v421_v15, 0.0 }
  0xcc   :  { %v396_v19 = vpop.f32.mrf.mxu3 }
  0xcd   :  { %v508_v18 = vpack.c.bf16 %v483_v17, %v482_v16  ;;  %v397_v7 = vadd.f32 %v1234_v34, %v396_v19 }
  0xce   :  { %v344_v20 = vpop.f32.mrf.mxu0 }
  0xcf   :  { %v423_v21 = vpop.f32.mrf.mxu1  ;;  %606 = vmatmul.bf16.gmra.mxu2 %v508_v18  ;;  %v345_v22 = vadd.f32 %v1234_v34, %v344_v20 }
  0xd1   :  { %v424_v27 = vadd.f32 %v423_v21, %v345_v22 }
  0xd3   :  { %v484_v32 = vmax.f32 %v424_v27, 0.0 }
  0xd4   :  { %v463_v23 = vpop.f32.mrf.mxu3 }
  0xd5   :  { %v464_v31 = vadd.f32 %v463_v23, %v385_v24 }
  0xd6   :  { %v346_v25 = vpop.f32.mrf.mxu0 }
  0xd7   :  { %v425_v26 = vpop.f32.mrf.mxu1  ;;  %v347_v28 = vadd.f32 %v1234_v34, %v346_v25  ;;  %v500_v40 = vmax.f32 %v464_v31, 0.0 }
  0xd9   :  { %v426_v29 = vadd.f32 %v425_v26, %v347_v28 }
  0xdb   :  { %v485_v33 = vmax.f32 %v426_v29, 0.0 }
  0xdc   :  { %v465_v37 = vpop.f32.mrf.mxu3 }
  0xdd   :  { %v509_v35 = vpack.c.bf16 %v485_v33, %v484_v32  ;;  %v466_v41 = vadd.f32 %v465_v37, %v387_v30 }
  0xde   :  { %v349_v38 = vpop.f32.mrf.mxu0 }
  0xdf   :  { %v428_v39 = vpop.f32.mrf.mxu1  ;;  %611 = vmatmul.bf16.gmra.mxu2 %v509_v35  ;;  %v501_v42 = vmax.f32 %v466_v41, 0.0  ;;  %v350_v43 = vadd.f32 %v1234_v34, %v349_v38 }
  0xe1   :  { %v517_v36 = vpack.c.bf16 %v501_v42, %v500_v40  ;;  %v429_v48 = vadd.f32 %v428_v39, %v350_v43 }
  0xe3   :  { %651 = vmatmul.bf16.vlgmr.msra.gmra.mxu3 %v517_v36  ;;  %v486_v53 = vmax.f32 %v429_v48, 0.0 }
  0xe4   :  { %v468_v44 = vpop.f32.mrf.mxu3 }
  0xe5   :  { %v469_v52 = vadd.f32 %v468_v44, %v390_v45 }
  0xe6   :  { %v351_v46 = vpop.f32.mrf.mxu0 }
  0xe7   :  { %v430_v47 = vpop.f32.mrf.mxu1  ;;  %v352_v49 = vadd.f32 %v1234_v34, %v351_v46  ;;  %v502_v60 = vmax.f32 %v469_v52, 0.0 }
  0xe9   :  { %v431_v50 = vadd.f32 %v430_v47, %v352_v49 }
  0xeb   :  { %v487_v54 = vmax.f32 %v431_v50, 0.0 }
  0xec   :  { %v470_v57 = vpop.f32.mrf.mxu3 }
  0xed   :  { %v510_v56 = vpack.c.bf16 %v487_v54, %v486_v53  ;;  %v471_v61 = vadd.f32 %v470_v57, %v392_v51  ;;  %v1287_v53 = vld [vmem:[%s1409_s4] ss:$0 sm:$0xff] }
  0xee   :  { %v354_v58 = vpop.f32.mrf.mxu0 }
  0xef   :  { %v433_v59 = vpop.f32.mrf.mxu1  ;;  %616 = vmatmul.bf16.gmra.mxu2 %v510_v56  ;;  %v503_v62 = vmax.f32 %v471_v61, 0.0  ;;  %v355_v63 = vadd.f32 %v1234_v34, %v354_v58 }
  0xf1   :  { %v518_v55 = vpack.c.bf16 %v503_v62, %v502_v60  ;;  %v434_v4 = vadd.f32 %v433_v59, %v355_v63 }
  0xf3   :  { %656 = vmatmul.bf16.gmra.mxu3 %v518_v55  ;;  %v488_v9 = vmax.f32 %v434_v4, 0.0 }
  0xf4   :  { %v473_v0 = vpop.f32.mrf.mxu3 }
  0xf5   :  { %v474_v8 = vadd.f32 %v473_v0, %v395_v1 }
  0xf6   :  { %v356_v2 = vpop.f32.mrf.mxu0 }
  0xf7   :  { %v435_v3 = vpop.f32.mrf.mxu1  ;;  %v357_v5 = vadd.f32 %v1234_v34, %v356_v2  ;;  %v504_v16 = vmax.f32 %v474_v8, 0.0 }
  0xf9   :  { %v436_v6 = vadd.f32 %v435_v3, %v357_v5 }
  0xfb   :  { %v489_v11 = vmax.f32 %v436_v6, 0.0 }
  0xfc   :  { %v475_v13 = vpop.f32.mrf.mxu3 }
  0xfd   :  { %v511_v12 = vpack.c.bf16 %v489_v11, %v488_v9  ;;  %v476_v17 = vadd.f32 %v475_v13, %v397_v7 }
  0xfe   :  { %v359_v14 = vpop.f32.mrf.mxu0 }
  0xff   :  { %v438_v15 = vpop.f32.mrf.mxu1  ;;  %621 = vmatmul.bf16.gmra.mxu2 %v511_v12  ;;  %v505_v18 = vmax.f32 %v476_v17, 0.0  ;;  %v360_v20 = vadd.f32 %v1234_v34, %v359_v14 }
 0x101   :  { %v519_v10 = vpack.c.bf16 %v505_v18, %v504_v16  ;;  %v439_v23 = vadd.f32 %v438_v15, %v360_v20 }
 0x103   :  { %661 = vmatmul.bf16.gmra.mxu3 %v519_v10  ;;  %v490_v25 = vmax.f32 %v439_v23, 0.0 }
 0x106   :  { %v361_v21 = vpop.f32.mrf.mxu0 }
 0x107   :  { %v440_v22 = vpop.f32.mrf.mxu1  ;;  %v362_v19 = vadd.f32 %v1234_v34, %v361_v21 }
 0x109   :  { %v441_v24 = vadd.f32 %v440_v22, %v362_v19 }
 0x10b   :  { %v491_v26 = vmax.f32 %v441_v24, 0.0 }
 0x10d   :  { %v512_v27 = vpack.c.bf16 %v491_v26, %v490_v25 }
 0x10e   :  { %v364_v28 = vpop.f32.mrf.mxu0 }
 0x10f   :  { %v443_v29 = vpop.f32.mrf.mxu1  ;;  %626 = vmatmul.bf16.gmra.mxu2 %v512_v27  ;;  %v365_v30 = vadd.f32 %v1234_v34, %v364_v28 }
 0x111   :  { %v444_v33 = vadd.f32 %v443_v29, %v365_v30 }
 0x113   :  { %v492_v38 = vmax.f32 %v444_v33, 0.0 }
 0x116   :  { %v366_v31 = vpop.f32.mrf.mxu0 }
 0x117   :  { %v445_v32 = vpop.f32.mrf.mxu1  ;;  %v367_v35 = vadd.f32 %v1234_v34, %v366_v31 }
 0x119   :  { %v446_v37 = vadd.f32 %v445_v32, %v367_v35 }
 0x11b   :  { %v493_v39 = vmax.f32 %v446_v37, 0.0 }
 0x11d   :  { %v513_v40 = vpack.c.bf16 %v493_v39, %v492_v38 }
 0x11e   :  { %v369_v41 = vpop.f32.mrf.mxu0 }
 0x11f   :  { %v448_v42 = vpop.f32.mrf.mxu1  ;;  %631 = vmatmul.bf16.gmra.mxu2 %v513_v40  ;;  %v370_v36 = vadd.f32 %v1234_v34, %v369_v41 }
 0x121   :  { %v449_v45 = vadd.f32 %v448_v42, %v370_v36 }
 0x123   :  { %v494_v48 = vmax.f32 %v449_v45, 0.0 }
 0x126   :  { %v371_v43 = vpop.f32.mrf.mxu0 }
 0x127   :  { %v450_v44 = vpop.f32.mrf.mxu1  ;;  %v372_v46 = vadd.f32 %v1234_v34, %v371_v43 }
 0x129   :  { %v451_v47 = vadd.f32 %v450_v44, %v372_v46 }
 0x12b   :  { %v495_v49 = vmax.f32 %v451_v47, 0.0 }
 0x12d   :  { %v514_v50 = vpack.c.bf16 %v495_v49, %v494_v48 }
 0x12e   :  { %v374_v51 = vpop.f32.mrf.mxu0 }
 0x12f   :  { %v453_v52 = vpop.f32.mrf.mxu1  ;;  %636 = vmatmul.bf16.gmra.mxu2 %v514_v50  ;;  %v375_v56 = vadd.f32 %v1234_v34, %v374_v51 }
 0x131   :  { %v454_v60 = vadd.f32 %v453_v52, %v375_v56 }
 0x132   :  { %v597_v54 = vpop.f32.mrf.mxu2 }
 0x133   :  { %v598_v57 = vadd.f32 %v1287_v53, %v597_v54  ;;  %v496_v63 = vmax.f32 %v454_v60, 0.0 }
 0x135   :  { %667 = vst [vmem:[%s1410_s5] sm:$0xff] %v598_v57 }
 0x136   :  { %v376_v58 = vpop.f32.mrf.mxu0 }
 0x137   :  { %v455_v59 = vpop.f32.mrf.mxu1  ;;  %v377_v61 = vadd.f32 %v1234_v34, %v376_v58 }
 0x139   :  { %v456_v62 = vadd.f32 %v455_v59, %v377_v61 }
 0x13a   :  { %v599_v55 = vpop.f32.mrf.mxu2 }
 0x13b   :  { %v497_v0 = vmax.f32 %v456_v62, 0.0  ;;  %v600_v1 = vadd.f32 %v1287_v53, %v599_v55 }
 0x13d   :  { %668 = vst [vmem:[%s1410_s5 + $0x8] sm:$0xff] %v600_v1  ;;  %v515_v2 = vpack.c.bf16 %v497_v0, %v496_v63 }
 0x13e   :  { %v379_v3 = vpop.f32.mrf.mxu0 }
 0x13f   :  { %v458_v4 = vpop.f32.mrf.mxu1  ;;  %641 = vmatmul.bf16.gmra.mxu2 %v515_v2  ;;  %v380_v6 = vadd.f32 %v1234_v34, %v379_v3 }
 0x141   :  { %v459_v9 = vadd.f32 %v458_v4, %v380_v6 }
 0x142   :  { %v602_v5 = vpop.f32.mrf.mxu2 }
 0x143   :  { %v603_v7 = vadd.f32 %v1287_v53, %v602_v5  ;;  %v498_v15 = vmax.f32 %v459_v9, 0.0 }
 0x145   :  { %669 = vst [vmem:[%s1410_s5 + $0x10] sm:$0xff] %v603_v7 }
 0x146   :  { %v381_v8 = vpop.f32.mrf.mxu0 }
 0x147   :  { %v382_v11 = vadd.f32 %v1234_v34, %v381_v8  ;;  %v460_v12 = vpop.f32.mrf.mxu1 }
 0x149   :  { %v461_v13 = vadd.f32 %v460_v12, %v382_v11 }
 0x14a   :  { %v604_v14 = vpop.f32.mrf.mxu2 }
 0x14b   :  { %v499_v16 = vmax.f32 %v461_v13, 0.0  ;;  %v605_v17 = vadd.f32 %v1287_v53, %v604_v14 }
 0x14d   :  { %670 = vst [vmem:[%s1410_s5 + $0x18] sm:$0xff] %v605_v17  ;;  %v516_v18 = vpack.c.bf16 %v499_v16, %v498_v15 }
 0x14f   :  { %646 = vmatmul.bf16.gmra.mxu2 %v516_v18 }
 0x152   :  { %v607_v10 = vpop.f32.mrf.mxu2 }
 0x153   :  { %v608_v20 = vadd.f32 %v1287_v53, %v607_v10 }
 0x155   :  { %671 = vst [vmem:[%s1410_s5 + $0x20] sm:$0xff] %v608_v20 }
 0x15a   :  { %v609_v34 = vpop.f32.mrf.mxu2 }
 0x15b   :  { %v610_v21 = vadd.f32 %v1287_v53, %v609_v34 }
 0x15d   :  { %672 = vst [vmem:[%s1410_s5 + $0x28] sm:$0xff] %v610_v21 }
 0x162   :  { %v612_v22 = vpop.f32.mrf.mxu2 }
 0x163   :  { %v613_v23 = vadd.f32 %v1287_v53, %v612_v22 }
 0x165   :  { %673 = vst [vmem:[%s1410_s5 + $0x30] sm:$0xff] %v613_v23 }
 0x166   :  { %v652_v19 = vpop.f32.mrf.mxu3 }
 0x167   :  { %v653_v24 = vadd.f32 %v1287_v53, %v652_v19 }
 0x169   :  { %689 = vst [vmem:[%s1410_s5 + $0xb0] sm:$0xff] %v653_v24 }
 0x16a   :  { %v614_v25 = vpop.f32.mrf.mxu2 }
 0x16b   :  { %v615_v26 = vadd.f32 %v1287_v53, %v614_v25 }
 0x16d   :  { %674 = vst [vmem:[%s1410_s5 + $0x38] sm:$0xff] %v615_v26 }
 0x16e   :  { %v654_v27 = vpop.f32.mrf.mxu3 }
 0x16f   :  { %v655_v28 = vadd.f32 %v1287_v53, %v654_v27 }
 0x171   :  { %690 = vst [vmem:[%s1410_s5 + $0xb8] sm:$0xff] %v655_v28 }
 0x172   :  { %v617_v29 = vpop.f32.mrf.mxu2 }
 0x173   :  { %v618_v30 = vadd.f32 %v1287_v53, %v617_v29 }
 0x175   :  { %675 = vst [vmem:[%s1410_s5 + $0x40] sm:$0xff] %v618_v30 }
 0x176   :  { %v657_v31 = vpop.f32.mrf.mxu3 }
 0x177   :  { %v658_v32 = vadd.f32 %v1287_v53, %v657_v31 }
 0x179   :  { %691 = vst [vmem:[%s1410_s5 + $0xc0] sm:$0xff] %v658_v32 }
 0x17a   :  { %v619_v33 = vpop.f32.mrf.mxu2 }
 0x17b   :  { %v620_v35 = vadd.f32 %v1287_v53, %v619_v33 }
 0x17d   :  { %676 = vst [vmem:[%s1410_s5 + $0x48] sm:$0xff] %v620_v35 }
 0x17e   :  { %v659_v37 = vpop.f32.mrf.mxu3 }
 0x17f   :  { %v660_v38 = vadd.f32 %v1287_v53, %v659_v37 }
 0x181   :  { %692 = vst [vmem:[%s1410_s5 + $0xc8] sm:$0xff] %v660_v38 }
 0x182   :  { %v622_v39 = vpop.f32.mrf.mxu2 }
 0x183   :  { %v623_v40 = vadd.f32 %v1287_v53, %v622_v39 }
 0x185   :  { %677 = vst [vmem:[%s1410_s5 + $0x50] sm:$0xff] %v623_v40 }
 0x186   :  { %v662_v41 = vpop.f32.mrf.mxu3 }
 0x187   :  { %v663_v42 = vadd.f32 %v1287_v53, %v662_v41 }
 0x189   :  { %693 = vst [vmem:[%s1410_s5 + $0xd0] sm:$0xff] %v663_v42 }
 0x18a   :  { %v624_v36 = vpop.f32.mrf.mxu2 }
 0x18b   :  { %v625_v43 = vadd.f32 %v1287_v53, %v624_v36 }
 0x18d   :  { %678 = vst [vmem:[%s1410_s5 + $0x58] sm:$0xff] %v625_v43 }
 0x18e   :  { %v664_v44 = vpop.f32.mrf.mxu3 }
 0x18f   :  { %v665_v45 = vadd.f32 %v1287_v53, %v664_v44 }
 0x191   :  { %694 = vst [vmem:[%s1410_s5 + $0xd8] sm:$0xff] %v665_v45 }
 0x192   :  { %v627_v46 = vpop.f32.mrf.mxu2 }
 0x193   :  { %v628_v47 = vadd.f32 %v1287_v53, %v627_v46 }
 0x195   :  { %679 = vst [vmem:[%s1410_s5 + $0x60] sm:$0xff] %v628_v47 }
 0x19a   :  { %v629_v48 = vpop.f32.mrf.mxu2 }
 0x19b   :  { %v630_v49 = vadd.f32 %v1287_v53, %v629_v48 }
 0x19d   :  { %680 = vst [vmem:[%s1410_s5 + $0x68] sm:$0xff] %v630_v49 }
 0x1a2   :  { %v632_v50 = vpop.f32.mrf.mxu2 }
 0x1a3   :  { %v633_v51 = vadd.f32 %v1287_v53, %v632_v50 }
 0x1a5   :  { %681 = vst [vmem:[%s1410_s5 + $0x70] sm:$0xff] %v633_v51 }
 0x1aa   :  { %v634_v52 = vpop.f32.mrf.mxu2 }
 0x1ab   :  { %v635_v54 = vadd.f32 %v1287_v53, %v634_v52 }
 0x1ad   :  { %682 = vst [vmem:[%s1410_s5 + $0x78] sm:$0xff] %v635_v54 }
 0x1b2   :  { %v637_v56 = vpop.f32.mrf.mxu2 }
 0x1b3   :  { %v638_v57 = vadd.f32 %v1287_v53, %v637_v56 }
 0x1b5   :  { %683 = vst [vmem:[%s1410_s5 + $0x80] sm:$0xff] %v638_v57 }
 0x1ba   :  { %v639_v58 = vpop.f32.mrf.mxu2 }
 0x1bb   :  { %v640_v59 = vadd.f32 %v1287_v53, %v639_v58 }
 0x1bd   :  { %684 = vst [vmem:[%s1410_s5 + $0x88] sm:$0xff] %v640_v59 }
 0x1c2   :  { %v642_v60 = vpop.f32.mrf.mxu2 }
 0x1c3   :  { %v643_v61 = vadd.f32 %v1287_v53, %v642_v60 }
 0x1c5   :  { %685 = vst [vmem:[%s1410_s5 + $0x90] sm:$0xff] %v643_v61 }
 0x1ca   :  { %v644_v62 = vpop.f32.mrf.mxu2 }
 0x1cb   :  { %v645_v55 = vadd.f32 %v1287_v53, %v644_v62 }
 0x1cd   :  { %686 = vst [vmem:[%s1410_s5 + $0x98] sm:$0xff] %v645_v55 }
 0x1d2   :  { %v647_v63 = vpop.f32.mrf.mxu2 }
 0x1d3   :  { %v648_v0 = vadd.f32 %v1287_v53, %v647_v63 }
 0x1d5   :  { %687 = vst [vmem:[%s1410_s5 + $0xa0] sm:$0xff] %v648_v0 }
 0x1da   :  { %v649_v1 = vpop.f32.mrf.mxu2 }
 0x1db   :  { %v650_v2 = vadd.f32 %v1287_v53, %v649_v1 }
 0x1dd   :  { %688 = vst [vmem:[%s1410_s5 + $0xa8] sm:$0xff] %v650_v2 }

</bundles_post_ra>
